<compile_context>
chip_gen: v6e
topology: v6e:2x2x1
jax: 0.10.0
libtpu: 0.0.40
codegen_flags: <defaults>
</compile_context>

<pallas_src>
import jax
import jax.numpy as jnp
from jax.experimental import pallas as pl
from jax.experimental.pallas import tpu as pltpu


def _default_vmem_limit():
    try:
        info = pltpu.get_tpu_info()
        cap = getattr(info, "vmem_capacity_bytes", None)
        if cap:
            # keep scoped limit well under physical capacity (v7x: 64 MiB/TC)
            return min(64 * 1024 * 1024, int(cap * 0.6))
    except Exception:
        pass
    return 32 * 1024 * 1024


_VMEM_LIMIT = _default_vmem_limit()


def _choose_bm(M, target):
    """Largest row tile <= target that divides M and is a multiple of 8, else M."""
    if M <= target:
        return M
    for bm in range(min(target, M), 7, -1):
        if M % bm == 0 and bm % 8 == 0:
            return bm
    return M


# ----------------------------------------------------------------------------
# Row-tiled linear / FFN / layernorm kernels (small, used around the big fused
# encoder kernels)
# ----------------------------------------------------------------------------

def _linear_kernel(x_ref, w_ref, b_ref, o_ref):
    y = jnp.dot(x_ref[...].astype(jnp.bfloat16), w_ref[...],
                preferred_element_type=jnp.float32) + b_ref[...]
    o_ref[...] = y.astype(o_ref.dtype)


def pallas_linear(x, w, b, out_dtype=jnp.float32, block_m=512):
    """x: [M, K], w: [K, N] bf16, b: [N] f32 -> [M, N] (row-tiled)."""
    M, K = x.shape
    N = w.shape[1]
    bm = _choose_bm(M, block_m)
    return pl.pallas_call(
        _linear_kernel,
        out_shape=jax.ShapeDtypeStruct((M, N), out_dtype),
        grid=(M // bm,),
        in_specs=[
            pl.BlockSpec((bm, K), lambda i: (i, 0)),
            pl.BlockSpec((K, N), lambda i: (0, 0)),
            pl.BlockSpec((1, N), lambda i: (0, 0)),
        ],
        out_specs=pl.BlockSpec((bm, N), lambda i: (i, 0)),
        compiler_params=pltpu.CompilerParams(
            dimension_semantics=("parallel",), vmem_limit_bytes=_VMEM_LIMIT),
    )(x, w, b.reshape(1, N))


def _ffn_kernel(x_ref, w1_ref, b1_ref, w2_ref, b2_ref, o_ref):
    h = jnp.dot(x_ref[...].astype(jnp.bfloat16), w1_ref[...],
                preferred_element_type=jnp.float32) + b1_ref[...]
    # TODO(synk): PyTorch nn.GELU defaults to exact erf; tanh approximation used.
    h = jax.nn.gelu(h)
    y = jnp.dot(h.astype(jnp.bfloat16), w2_ref[...],
                preferred_element_type=jnp.float32) + b2_ref[...]
    o_ref[...] = y.astype(o_ref.dtype)


def pallas_ffn(x, w1, b1, w2, b2, out_dtype=jnp.float32, block_m=512):
    """Fused (x @ w1 + b1) -> gelu -> (@ w2 + b2), row-tiled (time-cond MLP)."""
    M, D = x.shape
    F = w1.shape[1]
    N = w2.shape[1]
    bm = _choose_bm(M, block_m)
    return pl.pallas_call(
        _ffn_kernel,
        out_shape=jax.ShapeDtypeStruct((M, N), out_dtype),
        grid=(M // bm,),
        in_specs=[
            pl.BlockSpec((bm, D), lambda i: (i, 0)),
            pl.BlockSpec((D, F), lambda i: (0, 0)),
            pl.BlockSpec((1, F), lambda i: (0, 0)),
            pl.BlockSpec((F, N), lambda i: (0, 0)),
            pl.BlockSpec((1, N), lambda i: (0, 0)),
        ],
        out_specs=pl.BlockSpec((bm, N), lambda i: (i, 0)),
        compiler_params=pltpu.CompilerParams(
            dimension_semantics=("parallel",), vmem_limit_bytes=_VMEM_LIMIT),
    )(x, w1, b1.reshape(1, -1), w2, b2.reshape(1, -1))


def _layernorm_kernel(x_ref, g_ref, b_ref, o_ref):
    x = x_ref[...].astype(jnp.float32)
    mu = jnp.mean(x, axis=-1, keepdims=True)
    xc = x - mu
    var = jnp.mean(xc * xc, axis=-1, keepdims=True)
    o_ref[...] = (xc * jax.lax.rsqrt(var + 1e-5) * g_ref[...] + b_ref[...]
                  ).astype(o_ref.dtype)


def pallas_layernorm(x, g, b, out_dtype=jnp.float32, block_m=1024):
    M, D = x.shape
    bm = _choose_bm(M, block_m)
    return pl.pallas_call(
        _layernorm_kernel,
        out_shape=jax.ShapeDtypeStruct((M, D), out_dtype),
        grid=(M // bm,),
        in_specs=[
            pl.BlockSpec((bm, D), lambda i: (i, 0)),
            pl.BlockSpec((1, D), lambda i: (0, 0)),
            pl.BlockSpec((1, D), lambda i: (0, 0)),
        ],
        out_specs=pl.BlockSpec((bm, D), lambda i: (i, 0)),
        compiler_params=pltpu.CompilerParams(
            dimension_semantics=("parallel",), vmem_limit_bytes=_VMEM_LIMIT),
    )(x, g.reshape(1, -1), b.reshape(1, -1))


def _norm_linear_kernel(x_ref, g_ref, b_ref, w_ref, bias_ref, o_ref):
    x = x_ref[...].astype(jnp.float32)
    mu = jnp.mean(x, axis=-1, keepdims=True)
    xc = x - mu
    var = jnp.mean(xc * xc, axis=-1, keepdims=True)
    xn = xc * jax.lax.rsqrt(var + 1e-5) * g_ref[...] + b_ref[...]
    y = jnp.dot(xn.astype(jnp.bfloat16), w_ref[...],
                preferred_element_type=jnp.float32) + bias_ref[...]
    o_ref[...] = y.astype(o_ref.dtype)


def pallas_norm_linear(x, g, b, w, bias, out_dtype=jnp.float32, block_m=512):
    """Fused final LayerNorm + output projection."""
    M, D = x.shape
    N = w.shape[1]
    bm = _choose_bm(M, block_m)
    return pl.pallas_call(
        _norm_linear_kernel,
        out_shape=jax.ShapeDtypeStruct((M, N), out_dtype),
        grid=(M // bm,),
        in_specs=[
            pl.BlockSpec((bm, D), lambda i: (i, 0)),
            pl.BlockSpec((1, D), lambda i: (0, 0)),
            pl.BlockSpec((1, D), lambda i: (0, 0)),
            pl.BlockSpec((D, N), lambda i: (0, 0)),
            pl.BlockSpec((1, N), lambda i: (0, 0)),
        ],
        out_specs=pl.BlockSpec((bm, N), lambda i: (i, 0)),
        compiler_params=pltpu.CompilerParams(
            dimension_semantics=("parallel",), vmem_limit_bytes=_VMEM_LIMIT),
    )(x, g.reshape(1, -1), b.reshape(1, -1), w, bias.reshape(1, -1))


# ----------------------------------------------------------------------------
# Fused transformer STACK kernel: all layers of an encoder in ONE pallas_call.
# Grid iterates over layers; activation lives in a f32 VMEM scratch across
# layers; per-layer weights are DMA'd via a layer-indexed BlockSpec.
# ----------------------------------------------------------------------------

def _make_stacked_block_kernel(L, B, T, D, heads, dim_head, use_ada):
    inner = heads * dim_head
    scale = dim_head ** -0.5

    def ln(z):
        mu = jnp.mean(z, axis=-1, keepdims=True)
        zc = z - mu
        var = jnp.mean(zc * zc, axis=-1, keepdims=True)
        return zc * jax.lax.rsqrt(var + 1e-5)

    def modulate(zn, g, b):
        # zn: [B*T, D]; g/b: [B, D] (per-batch adaLN) or [1, D] (shared)
        if not use_ada:
            return zn * g + b
        parts = [zn[bi * T:(bi + 1) * T] * g[bi:bi + 1] + b[bi:bi + 1]
                 for bi in range(B)]
        return parts[0] if B == 1 else jnp.concatenate(parts, axis=0)

    def layer(x_flat, bias, g1, b1, g2, b2, qkv_w, qkv_b, o_w, o_b,
              w1, fb1, w2, fb2):
        # ---- attention branch (matmuls on the flattened [B*T, D] view) ----
        h = modulate(ln(x_flat), g1, b1)
        qkv = jnp.dot(h.astype(jnp.bfloat16), qkv_w,
                      preferred_element_type=jnp.float32) + qkv_b
        batch_outs = []
        for bi in range(B):
            rows = qkv[bi * T:(bi + 1) * T]
            kbias = bias[bi]                              # [1, T] key-padding bias
            o_acc = None
            for hd in range(heads):
                q = rows[:, hd * dim_head:(hd + 1) * dim_head] * scale
                k = rows[:, inner + hd * dim_head:inner + (hd + 1) * dim_head]
                v = rows[:, 2 * inner + hd * dim_head:2 * inner + (hd + 1) * dim_head]
                s = jax.lax.dot_general(
                    q.astype(jnp.bfloat16), k.astype(jnp.bfloat16),
                    (((1,), (1,)), ((), ())),
                    preferred_element_type=jnp.float32) + kbias
                s = s - jnp.max(s, axis=-1, keepdims=True)
                p = jnp.exp(s)
                p = p * pl.reciprocal(jnp.sum(p, axis=-1, keepdims=True), approx=True)
                pv = jnp.dot(p.astype(jnp.bfloat16), v.astype(jnp.bfloat16),
                             preferred_element_type=jnp.float32)        # [T, dh]
                oh = jnp.dot(pv.astype(jnp.bfloat16),
                             o_w[hd * dim_head:(hd + 1) * dim_head, :],
                             preferred_element_type=jnp.float32)        # [T, D]
                o_acc = oh if o_acc is None else o_acc + oh
            batch_outs.append(o_acc)
        attn = batch_outs[0] if B == 1 else jnp.concatenate(batch_outs, axis=0)
        x2 = x_flat + attn + o_b
        # ---- feed-forward branch ----
        h2 = modulate(ln(x2), g2, b2)
        f = jnp.dot(h2.astype(jnp.bfloat16), w1,
                    preferred_element_type=jnp.float32) + fb1
        # TODO(synk): PyTorch nn.GELU defaults to exact erf; tanh approximation used.
        f = jax.nn.gelu(f)
        f = jnp.dot(f.astype(jnp.bfloat16), w2,
                    preferred_element_type=jnp.float32) + fb2
        return x2 + f

    if use_ada:
        def kernel(x_ref, bias_ref, cond_ref, ada_w_ref, ada_b_ref,
                   qkv_w_ref, qkv_b_ref, o_w_ref, o_b_ref,
                   w1_ref, fb1_ref, w2_ref, fb2_ref, o_ref, x_sc):
            li = pl.program_id(0)

            @pl.when(li == 0)
            def _():
                x_sc[...] = x_ref[...].astype(jnp.float32)

            ada = jnp.dot(cond_ref[...].astype(jnp.bfloat16), ada_w_ref[0],
                          preferred_element_type=jnp.float32) + ada_b_ref[0]
            g1 = 1.0 + ada[:, 0:D]
            b1 = ada[:, D:2 * D]
            g2 = 1.0 + ada[:, 2 * D:3 * D]
            b2 = ada[:, 3 * D:4 * D]
            x_new = layer(x_sc[...], bias_ref[...], g1, b1, g2, b2,
                          qkv_w_ref[0], qkv_b_ref[0], o_w_ref[0], o_b_ref[0],
                          w1_ref[0], fb1_ref[0], w2_ref[0], fb2_ref[0])
            x_sc[...] = x_new

            @pl.when(li == L - 1)
            def _():
                o_ref[...] = x_new.astype(o_ref.dtype)
    else:
        def kernel(x_ref, bias_ref, g1_ref, b1_ref, g2_ref, b2_ref,
                   qkv_w_ref, qkv_b_ref, o_w_ref, o_b_ref,
                   w1_ref, fb1_ref, w2_ref, fb2_ref, o_ref, x_sc):
            li = pl.program_id(0)

            @pl.when(li == 0)
            def _():
                x_sc[...] = x_ref[...].astype(jnp.float32)

            x_new = layer(x_sc[...], bias_ref[...],
                          g1_ref[0], b1_ref[0], g2_ref[0], b2_ref[0],
                          qkv_w_ref[0], qkv_b_ref[0], o_w_ref[0], o_b_ref[0],
                          w1_ref[0], fb1_ref[0], w2_ref[0], fb2_ref[0])
            x_sc[...] = x_new

            @pl.when(li == L - 1)
            def _():
                o_ref[...] = x_new.astype(o_ref.dtype)

    return kernel


def pallas_transformer_stack(x, bias, sp, heads, dim_head, cond=None,
                             out_dtype=jnp.float32):
    """All L transformer blocks of one encoder in a single pallas_call.

    x: [B, T, D]; bias: [B, 1, T] additive key-padding bias; cond: [B, Dc]
    adaLN conditioning (None -> plain per-layer LayerNorm gamma/beta).
    Per-layer weights in `sp` are stacked along a leading layer axis L.
    """
    B, T, D = x.shape
    BT = B * T
    L = sp["qkv_w"].shape[0]
    inner = heads * dim_head
    ffd = sp["ff_w1"].shape[-1]
    x_flat = x.reshape(BT, D)

    in_specs = [
        pl.BlockSpec((BT, D), lambda l: (0, 0)),        # resident across layers
        pl.BlockSpec((B, 1, T), lambda l: (0, 0, 0)),
    ]
    args = [x_flat, bias]
    if cond is not None:
        Dc = cond.shape[-1]
        in_specs += [
            pl.BlockSpec((B, Dc), lambda l: (0, 0)),
            pl.BlockSpec((1, Dc, 4 * D), lambda l: (l, 0, 0)),
            pl.BlockSpec((1, 1, 4 * D), lambda l: (l, 0, 0)),
        ]
        args += [cond, sp["ada_w"], sp["ada_b"]]
    else:
        in_specs += [pl.BlockSpec((1, 1, D), lambda l: (l, 0, 0))] * 4
        args += [sp["ln1_g"], sp["ln1_b"], sp["ln2_g"], sp["ln2_b"]]
    in_specs += [
        pl.BlockSpec((1, D, 3 * inner), lambda l: (l, 0, 0)),
        pl.BlockSpec((1, 1, 3 * inner), lambda l: (l, 0, 0)),
        pl.BlockSpec((1, inner, D), lambda l: (l, 0, 0)),
        pl.BlockSpec((1, 1, D), lambda l: (l, 0, 0)),
        pl.BlockSpec((1, D, ffd), lambda l: (l, 0, 0)),
        pl.BlockSpec((1, 1, ffd), lambda l: (l, 0, 0)),
        pl.BlockSpec((1, ffd, D), lambda l: (l, 0, 0)),
        pl.BlockSpec((1, 1, D), lambda l: (l, 0, 0)),
    ]
    args += [sp["qkv_w"], sp["qkv_b"], sp["o_w"], sp["o_b"],
             sp["ff_w1"], sp["ff_b1"], sp["ff_w2"], sp["ff_b2"]]

    out = pl.pallas_call(
        _make_stacked_block_kernel(L, B, T, D, heads, dim_head, cond is not None),
        out_shape=jax.ShapeDtypeStruct((BT, D), out_dtype),
        grid=(L,),
        in_specs=in_specs,
        out_specs=pl.BlockSpec((BT, D), lambda l: (0, 0)),
        scratch_shapes=[pltpu.VMEM((BT, D), jnp.float32)],
        compiler_params=pltpu.CompilerParams(
            dimension_semantics=("arbitrary",), vmem_limit_bytes=_VMEM_LIMIT),
    )(*args)
    return out.reshape(B, T, D)


# ----------------------------------------------------------------------------
# Fused Conv1d ('same') + ReLU + LayerNorm + mask  (duration predictor layer)
# ----------------------------------------------------------------------------

def _make_conv_ln_kernel(k, T, Cin):
    def kernel(xp_ref, m_ref, w_ref, b_ref, g_ref, beta_ref, o_ref):
        xp = xp_ref[0].astype(jnp.float32)                     # [T + 2*pad, Cin]
        # im2col: one [T, k*Cin] patch -> single MXU contraction
        patches = jnp.concatenate([xp[i:i + T, :] for i in range(k)], axis=-1)
        y = jnp.dot(patches.astype(jnp.bfloat16), w_ref[...],
                    preferred_element_type=jnp.float32)
        y = jnp.maximum(y + b_ref[...], 0.0)                   # bias + ReLU
        mu = jnp.mean(y, axis=-1, keepdims=True)
        yc = y - mu
        var = jnp.mean(yc * yc, axis=-1, keepdims=True)
        y = yc * jax.lax.rsqrt(var + 1e-5) * g_ref[...] + beta_ref[...]
        y = y * m_ref[0]                                       # [T, 1] padding mask
        o_ref[...] = y[None].astype(o_ref.dtype)
    return kernel


def pallas_conv_ln(x, mask, w, b, ln_g, ln_b, kernel_size):
    """Conv1d (same) + ReLU + LayerNorm + mask.  x: [B,T,Cin], w: [k*Cin, Cout] bf16."""
    B, T, Cin = x.shape
    pad = kernel_size // 2
    xp = jnp.pad(x, ((0, 0), (pad, pad), (0, 0)))
    Tp = T + 2 * pad
    N = w.shape[1]
    return pl.pallas_call(
        _make_conv_ln_kernel(kernel_size, T, Cin),
        out_shape=jax.ShapeDtypeStruct((B, T, N), jnp.float32),
        grid=(B,),
        in_specs=[
            pl.BlockSpec((1, Tp, Cin), lambda bi: (bi, 0, 0)),
            pl.BlockSpec((1, T, 1), lambda bi: (bi, 0, 0)),
            pl.BlockSpec((kernel_size * Cin, N), lambda bi: (0, 0)),
            pl.BlockSpec((1, N), lambda bi: (0, 0)),
            pl.BlockSpec((1, N), lambda bi: (0, 0)),
            pl.BlockSpec((1, N), lambda bi: (0, 0)),
        ],
        out_specs=pl.BlockSpec((1, T, N), lambda bi: (bi, 0, 0)),
        compiler_params=pltpu.CompilerParams(
            dimension_semantics=("parallel",), vmem_limit_bytes=_VMEM_LIMIT),
    )(xp, mask, w, b.reshape(1, -1), ln_g.reshape(1, -1), ln_b.reshape(1, -1))


# ----------------------------------------------------------------------------
# Lane-dense masked MSE (flatten -> pad -> (rows, 128) tiles, grid reduction)
# ----------------------------------------------------------------------------

def _mse_kernel(p_ref, t_ref, m_ref, o_ref, num_acc, den_acc):
    @pl.when(pl.program_id(0) == 0)
    def _():
        num_acc[...] = jnp.zeros_like(num_acc)
        den_acc[...] = jnp.zeros_like(den_acc)

    p = p_ref[...].astype(jnp.float32)
    t = t_ref[...].astype(jnp.float32)
    m = m_ref[...]
    d = (p - t) * m
    num_acc[...] += jnp.sum(d * d, keepdims=True)
    den_acc[...] += jnp.sum(m, keepdims=True)

    @pl.when(pl.program_id(0) == pl.num_programs(0) - 1)
    def _():
        o_ref[...] = num_acc[...] / jnp.maximum(den_acc[...], 1.0)


def pallas_masked_mse(pred, target, mask_elem, block_rows=1024):
    """mean((pred - target)^2) over elements where mask_elem == 1 (lane-dense)."""
    flat_p = pred.reshape(-1).astype(jnp.float32)
    flat_t = target.reshape(-1).astype(jnp.float32)
    flat_m = mask_elem.reshape(-1).astype(jnp.float32)
    n = flat_p.shape[0]
    chunk = 8 * 128
    n_pad = ((n + chunk - 1) // chunk) * chunk
    if n_pad != n:
        extra = n_pad - n
        flat_p = jnp.pad(flat_p, (0, extra))
        flat_t = jnp.pad(flat_t, (0, extra))
        flat_m = jnp.pad(flat_m, (0, extra))
    rows = n_pad // 128
    bm = _choose_bm(rows, block_rows)
    out = pl.pallas_call(
        _mse_kernel,
        out_shape=jax.ShapeDtypeStruct((1, 1), jnp.float32),
        grid=(rows // bm,),
        in_specs=[
            pl.BlockSpec((bm, 128), lambda i: (i, 0)),
            pl.BlockSpec((bm, 128), lambda i: (i, 0)),
            pl.BlockSpec((bm, 128), lambda i: (i, 0)),
        ],
        out_specs=pl.BlockSpec((1, 1), lambda i: (0, 0)),
        scratch_shapes=[pltpu.VMEM((1, 1), jnp.float32),
                        pltpu.VMEM((1, 1), jnp.float32)],
        compiler_params=pltpu.CompilerParams(
            dimension_semantics=("arbitrary",), vmem_limit_bytes=_VMEM_LIMIT),
    )(flat_p.reshape(rows, 128), flat_t.reshape(rows, 128), flat_m.reshape(rows, 128))
    return out[0, 0]


# ----------------------------------------------------------------------------
# Fused duration head: N=1 projection (VPU weighted lane-sum) + masked MSE loss
# ----------------------------------------------------------------------------

def _dur_head_loss_kernel(x_ref, w_ref, b_ref, tgt_ref, m_ref, o_ref):
    x = x_ref[...].astype(jnp.float32)                  # [B, T, C]
    w = w_ref[...].astype(jnp.float32)                  # [1, C]
    pred = jnp.sum(x * w[None, :, :], axis=-1) + b_ref[...]   # [B, T]
    m = m_ref[...]
    d = (pred - tgt_ref[...]) * m
    num = jnp.sum(d * d, keepdims=True)
    den = jnp.sum(m, keepdims=True)
    o_ref[...] = num / jnp.maximum(den, 1.0)


def pallas_duration_head_loss(x, w, b, target, mask):
    """x: [B,T,C] conv features; w: [C,1]; target/mask: [B,T] -> scalar loss."""
    B, T, C = x.shape
    out = pl.pallas_call(
        _dur_head_loss_kernel,
        out_shape=jax.ShapeDtypeStruct((1, 1), jnp.float32),
        compiler_params=pltpu.CompilerParams(vmem_limit_bytes=_VMEM_LIMIT),
    )(x, w.reshape(1, C).astype(jnp.float32), b.reshape(1, 1),
      target.astype(jnp.float32), mask.astype(jnp.float32))
    return out[0, 0]


# ----------------------------------------------------------------------------
# Parameter init (deterministic, synthetic); matmul weights stored in bf16,
# stacked per-layer along a leading L axis for the fused encoder kernels.
# ----------------------------------------------------------------------------

class KeyGen:
    def __init__(self, seed=0):
        self.key = jax.random.PRNGKey(seed)

    def __call__(self):
        self.key, sub = jax.random.split(self.key)
        return sub


def xavier(key, shape):
    fan_in, fan_out = shape[0], shape[1]
    lim = (6.0 / (fan_in + fan_out)) ** 0.5
    return jax.random.uniform(key, shape, jnp.float32, -lim, lim)


def xavier_bf16(key, shape):
    return xavier(key, shape).astype(jnp.bfloat16)


def make_stacked_block_params(kg, L, D, inner, ff_dim, cond_dim=None):
    def stack(make):
        return jnp.stack([make() for _ in range(L)], axis=0)

    p = {}
    if cond_dim is not None:
        p["ada_w"] = stack(lambda: xavier_bf16(kg(), (cond_dim, 4 * D)))
        p["ada_b"] = jnp.zeros((L, 1, 4 * D), jnp.float32)
    else:
        p["ln1_g"] = jnp.ones((L, 1, D), jnp.float32)
        p["ln1_b"] = jnp.zeros((L, 1, D), jnp.float32)
        p["ln2_g"] = jnp.ones((L, 1, D), jnp.float32)
        p["ln2_b"] = jnp.zeros((L, 1, D), jnp.float32)
    p["qkv_w"] = stack(lambda: xavier_bf16(kg(), (D, 3 * inner)))
    p["qkv_b"] = jnp.zeros((L, 1, 3 * inner), jnp.float32)
    p["o_w"] = stack(lambda: xavier_bf16(kg(), (inner, D)))
    p["o_b"] = jnp.zeros((L, 1, D), jnp.float32)
    p["ff_w1"] = stack(lambda: xavier_bf16(kg(), (D, ff_dim)))
    p["ff_b1"] = jnp.zeros((L, 1, ff_dim), jnp.float32)
    p["ff_w2"] = stack(lambda: xavier_bf16(kg(), (ff_dim, D)))
    p["ff_b2"] = jnp.zeros((L, 1, D), jnp.float32)
    return p


# ----------------------------------------------------------------------------
# Model pieces (plain-JAX orchestration over Pallas kernels)
# ----------------------------------------------------------------------------

def mask_to_bias(mask, B, T):
    """Key-padding additive bias [B, 1, T] shared over heads (broadcast in-kernel)."""
    if mask is None:
        return jnp.zeros((B, 1, T), jnp.float32)
    return jnp.where(mask, 0.0, -1e9).astype(jnp.float32)[:, None, :]


def spk_encoder_fwd(p, prompts, heads, dim_head):
    # TODO(synk): conv positional-encoding stack (conv_pos_depth x grouped Conv1d) omitted.
    B, T, Cin = prompts.shape
    x = pallas_linear(prompts.reshape(B * T, Cin), p["in_w"], p["in_b"],
                      out_dtype=jnp.bfloat16).reshape(B, T, -1)
    bias = mask_to_bias(None, B, T)
    x = pallas_transformer_stack(x, bias, p["blocks"], heads, dim_head,
                                 cond=None, out_dtype=jnp.bfloat16)
    D = x.shape[-1]
    x = pallas_layernorm(x.reshape(B * T, D), p["out_g"], p["out_b"]).reshape(B, T, D)
    return jnp.mean(x, axis=1, keepdims=True)          # [B, 1, dim_spk]


def text_encoder_fwd(p, tokens, spk_emb, padding_mask, heads, dim_head):
    # TODO(synk): conv positional-encoding stack omitted; embedding gather stays in JAX.
    B, T = tokens.shape
    text_emb = p["emb"][tokens]                         # [B, T, Dt] f32
    bias = mask_to_bias(padding_mask, B, T)
    cond = spk_emb.reshape(B, -1)
    x = pallas_transformer_stack(text_emb.astype(jnp.bfloat16), bias, p["blocks"],
                                 heads, dim_head, cond=cond, out_dtype=jnp.bfloat16)
    D = x.shape[-1]
    h = pallas_norm_linear(x.reshape(B * T, D), p["out_g"], p["out_b"],
                           p["proj_w"], p["proj_b"]).reshape(B, T, -1)
    return h, text_emb


def duration_predictor_features(p, text_emb, padding_mask, kernel_size):
    # TODO(synk): dropout layers omitted (forward run in eval / deterministic mode).
    B, T, _ = text_emb.shape
    m = padding_mask.astype(jnp.float32)[..., None]     # [B, T, 1]
    x = text_emb * m
    for layer in p["layers"]:
        x = pallas_conv_ln(x, m, layer["w"], layer["b"],
                           layer["ln_g"], layer["ln_b"], kernel_size)
    return x                                            # [B, T, dur_dim]


def timestep_embedding(t, dim, max_period=10000.0):
    half = dim // 2
    freqs = jnp.exp(-jnp.log(max_period) * jnp.arange(half, dtype=jnp.float32) / half)
    args = t[:, None] * freqs[None, :]
    return jnp.concatenate([jnp.cos(args), jnp.sin(args)], axis=-1)


def flow_matching_decoder_fwd(p, x, x_ctx, times, padding_mask, drop_ctx,
                              heads, dim_head, dim_time):
    # TODO(synk): conv positional-encoding stack omitted.
    B, T, F = x.shape
    x_ctx = jnp.where(drop_ctx[:, None, None], 0.0, x_ctx)
    t_sin = timestep_embedding(times, dim_time)
    t_cond = pallas_ffn(t_sin, p["t_w1"], p["t_b1"], p["t_w2"], p["t_b2"])    # [B, dim]
    h = pallas_linear(jnp.concatenate([x, x_ctx], axis=-1).reshape(B * T, 2 * F),
                      p["in_w"], p["in_b"], out_dtype=jnp.bfloat16).reshape(B, T, -1)
    bias = mask_to_bias(padding_mask, B, T)
    h = pallas_transformer_stack(h, bias, p["blocks"], heads, dim_head,
                                 cond=t_cond, out_dtype=jnp.bfloat16)
    D = h.shape[-1]
    vt = pallas_norm_linear(h.reshape(B * T, D), p["out_g"], p["out_b"],
                            p["proj_w"], p["proj_b"]).reshape(B, T, F)
    return vt


# ----------------------------------------------------------------------------
# PFlow glue: masks, length regulator, interpolation
# ----------------------------------------------------------------------------

def length_to_attn_mask(lens, T):
    return jnp.arange(T)[None, :] < lens[:, None]


def length_regulator(embs, emb_lens, durations, duration_lens):
    """repeat_interleave per sample + pad to max expanded length (data-dependent)."""
    # TODO(synk): jax.device_get here is a host sync; fine since the forward isn't jitted.
    B, T_text, C = embs.shape
    dur = jnp.where(jnp.arange(T_text)[None, :] < duration_lens[:, None], durations, 0)
    cum = jnp.cumsum(dur, axis=1)
    totals = cum[:, -1]
    max_len = int(jax.device_get(jnp.max(totals)))

    def one(emb, cum_b, total_b):
        j = jnp.arange(max_len)
        idx = jnp.searchsorted(cum_b, j, side="right")
        idx = jnp.clip(idx, 0, T_text - 1)
        out = emb[idx]
        return jnp.where((j < total_b)[:, None], out, 0.0)

    return jax.vmap(one)(embs, cum, totals)


def linear_interpolate(h, out_len):
    """F.interpolate(mode='linear', align_corners=False) along time axis."""
    B, T_in, C = h.shape
    if T_in == out_len:
        return h
    scale = T_in / out_len
    pos = (jnp.arange(out_len, dtype=jnp.float32) + 0.5) * scale - 0.5
    pos = jnp.clip(pos, 0.0, T_in - 1)
    lo = jnp.floor(pos).astype(jnp.int32)
    hi = jnp.minimum(lo + 1, T_in - 1)
    w = (pos - lo.astype(jnp.float32))[None, :, None]
    return h[:, lo, :] * (1.0 - w) + h[:, hi, :] * w


# ----------------------------------------------------------------------------
# PFlow model
# ----------------------------------------------------------------------------

class PFlowPallas:
    def __init__(self, seed=0, feature_dim=64, vocab_size=100,
                 text_dim=64, text_depth=2, text_heads=2, text_dim_head=32,
                 spk_dim=64, spk_depth=2, spk_heads=2, spk_dim_head=32,
                 fm_dim=128, fm_depth=2, fm_heads=2, fm_dim_head=64, fm_dim_time=64,
                 dur_dim=64, dur_depth=2, dur_kernel=3,
                 ff_mult=4, p_uncond=0.1, sigma=0.01, interpolate_mode="linear"):
        kg = KeyGen(seed)
        self.cfg = dict(feature_dim=feature_dim, text_heads=text_heads,
                        text_dim_head=text_dim_head, spk_heads=spk_heads,
                        spk_dim_head=spk_dim_head, fm_heads=fm_heads,
                        fm_dim_head=fm_dim_head, fm_dim_time=fm_dim_time,
                        dur_kernel=dur_kernel, p_uncond=p_uncond, sigma=sigma,
                        interpolate_mode=interpolate_mode)

        # speaker encoder (norm_type='layer' -> no ada cond)
        self.spk = {
            "in_w": xavier_bf16(kg(), (feature_dim, spk_dim)),
            "in_b": jnp.zeros((spk_dim,), jnp.float32),
            "blocks": make_stacked_block_params(kg, spk_depth, spk_dim,
                                                spk_heads * spk_dim_head,
                                                int(spk_dim * ff_mult)),
            "out_g": jnp.ones((spk_dim,), jnp.float32),
            "out_b": jnp.zeros((spk_dim,), jnp.float32),
        }
        # text encoder (norm_type='ada_proj', conditioned on spk_emb)
        self.text = {
            "emb": 0.02 * jax.random.normal(kg(), (vocab_size, text_dim), jnp.float32),
            "blocks": make_stacked_block_params(kg, text_depth, text_dim,
                                                text_heads * text_dim_head,
                                                int(text_dim * ff_mult),
                                                cond_dim=spk_dim),
            "out_g": jnp.ones((text_dim,), jnp.float32),
            "out_b": jnp.zeros((text_dim,), jnp.float32),
            "proj_w": xavier_bf16(kg(), (text_dim, feature_dim)),
            "proj_b": jnp.zeros((feature_dim,), jnp.float32),
        }
        # duration predictor (final N=1 projection fused into the loss kernel)
        self.dur = {
            "layers": [],
            "out_w": xavier_bf16(kg(), (dur_dim, 1)),
            "out_b": jnp.zeros((1,), jnp.float32),
        }
        cin = text_dim
        for _ in range(dur_depth):
            self.dur["layers"].append({
                "w": xavier_bf16(kg(), (dur_kernel * cin, dur_dim)),
                "b": jnp.zeros((dur_dim,), jnp.float32),
                "ln_g": jnp.ones((dur_dim,), jnp.float32),
                "ln_b": jnp.zeros((dur_dim,), jnp.float32),
            })
            cin = dur_dim
        # flow matching decoder (norm_type='ada_embed', conditioned on time embedding)
        self.fm = {
            "t_w1": xavier_bf16(kg(), (fm_dim_time, fm_dim)),
            "t_b1": jnp.zeros((fm_dim,), jnp.float32),
            "t_w2": xavier_bf16(kg(), (fm_dim, fm_dim)),
            "t_b2": jnp.zeros((fm_dim,), jnp.float32),
            "in_w": xavier_bf16(kg(), (2 * feature_dim, fm_dim)),
            "in_b": jnp.zeros((fm_dim,), jnp.float32),
            "blocks": make_stacked_block_params(kg, fm_depth, fm_dim,
                                                fm_heads * fm_dim_head,
                                                int(fm_dim * ff_mult),
                                                cond_dim=fm_dim),
            "out_g": jnp.ones((fm_dim,), jnp.float32),
            "out_b": jnp.zeros((fm_dim,), jnp.float32),
            "proj_w": xavier_bf16(kg(), (fm_dim, feature_dim)),
            "proj_b": jnp.zeros((feature_dim,), jnp.float32),
        }

    def forward(self, rng, text_tokens, text_token_lens, durations, duration_lens,
                latents, latent_lens, prompts, prompt_masks):
        c = self.cfg
        B, T_text = text_tokens.shape
        T_lat = latents.shape[1]
        F = latents.shape[2]

        # 1. speaker embedding
        spk_emb = spk_encoder_fwd(self.spk, prompts, c["spk_heads"], c["spk_dim_head"])

        # 2. text encoder
        text_padding_mask = length_to_attn_mask(text_token_lens, T_text)
        h, text_emb = text_encoder_fwd(self.text, text_tokens, spk_emb,
                                       text_padding_mask, c["text_heads"],
                                       c["text_dim_head"])

        # 3. duration predictor + duration loss (N=1 head fused with masked MSE)
        dur_feat = duration_predictor_features(self.dur, text_emb, text_padding_mask,
                                               c["dur_kernel"])
        dur_mask = length_to_attn_mask(duration_lens, T_text)
        duration_loss = pallas_duration_head_loss(
            dur_feat, self.dur["out_w"], self.dur["out_b"],
            jnp.log1p(durations.astype(jnp.float32)), dur_mask)

        # 4. length regulation + interpolation + encoder loss
        h = length_regulator(h, text_token_lens, durations, duration_lens)
        h = linear_interpolate(h, T_lat)
        latent_padding_mask = length_to_attn_mask(latent_lens, T_lat)
        loss_mask = (~prompt_masks) & latent_padding_mask
        mask_elem = jnp.broadcast_to(loss_mask[..., None], latents.shape)
        enc_loss = pallas_masked_mse(h, latents, mask_elem)

        # 5. flow matching (xt / flow mix in plain JAX -- trivially fused by XLA)
        k_t, k_x0, k_drop = jax.random.split(rng, 3)
        times = jax.random.uniform(k_t, (B,), jnp.float32)
        x0 = jax.random.normal(k_x0, latents.shape, jnp.float32)
        t_b = times[:, None, None]
        xt = (1.0 - (1.0 - c["sigma"]) * t_b) * x0 + t_b * latents
        flow = latents - (1.0 - c["sigma"]) * x0
        drop_cond = jax.random.uniform(k_drop, (B,), jnp.float32) < c["p_uncond"]

        vt = flow_matching_decoder_fwd(self.fm, xt, h, times, latent_padding_mask,
                                       drop_cond, c["fm_heads"], c["fm_dim_head"],
                                       c["fm_dim_time"])
        flow_matching_loss = pallas_masked_mse(vt, flow, mask_elem)

        lang_loss = None  # num_languages == 0
        return duration_loss, enc_loss, flow_matching_loss, lang_loss


# ----------------------------------------------------------------------------
# main
# ----------------------------------------------------------------------------

if __name__ == "__main__":
    key = jax.random.PRNGKey(0)
    k_tok, k_prompt, k_lat, k_fwd = jax.random.split(key, 4)

    B = 2
    T_text = 16
    T_prompt = 16
    feature_dim = 64
    vocab = 100

    text_tokens = jax.random.randint(k_tok, (B, T_text), 0, vocab, dtype=jnp.int32)
    text_token_lens = jnp.array([16, 12], jnp.int32)
    duration_lens = text_token_lens

    text_mask = jnp.arange(T_text)[None, :] < text_token_lens[:, None]
    dur_pattern = 1 + (jnp.arange(T_text) % 2)          # 1,2,1,2,...
    durations = jnp.where(text_mask, dur_pattern[None, :], 0).astype(jnp.int32)
    # expanded lengths: batch0 = 24, batch1 = 18
    T_lat = 24
    latent_lens = jnp.array([24, 18], jnp.int32)

    latents = jax.random.normal(k_lat, (B, T_lat, feature_dim), jnp.float32)
    prompts = jax.random.normal(k_prompt, (B, T_prompt, feature_dim), jnp.float32)
    prompt_masks = jnp.broadcast_to(jnp.arange(T_lat)[None, :] < 4, (B, T_lat))

    model = PFlowPallas(seed=0, feature_dim=feature_dim, vocab_size=vocab)
    out = model.forward(k_fwd, text_tokens, text_token_lens, durations, duration_lens,
                        latents, latent_lens, prompts, prompt_masks)
    duration_loss, enc_loss, flow_matching_loss, lang_loss = out
    jax.block_until_ready((duration_loss, enc_loss, flow_matching_loss))
    print("KERNEL_OK")
</pallas_src>

<mosaic_0001>
module attributes {stable_mosaic.version = 11 : i64} {
  func.func @_linear_kernel(%arg0: i32, %arg1: memref<32x64xf32, #tpu.memory_space<vmem>>, %arg2: memref<64x64xbf16, #tpu.memory_space<vmem>>, %arg3: memref<1x64xf32, #tpu.memory_space<vmem>>, %arg4: memref<32x64xbf16, #tpu.memory_space<vmem>>) attributes {dimension_semantics = [#tpu.dimension_semantics<parallel>], iteration_bounds = array<i64: 1>, scalar_prefetch = 0 : i64, scratch_operands = 0 : i64, tpu.core_type = #tpu.core_type<tc>, window_params = [{transform_indices = @transform_0, window_bounds = array<i64: 32, 64>}, {pipeline_mode = #tpu.pipeline_mode<synchronous>, transform_indices = @transform_1, window_bounds = array<i64: 64, 64>}, {pipeline_mode = #tpu.pipeline_mode<synchronous>, transform_indices = @transform_2, window_bounds = array<i64: 1, 64>}, {transform_indices = @transform_3, window_bounds = array<i64: 32, 64>}]} {
    %c0 = arith.constant 0 : index
    %c0_0 = arith.constant 0 : index
    %0 = vector.load %arg1[%c0, %c0_0] : memref<32x64xf32, #tpu.memory_space<vmem>>, vector<32x64xf32>
    %1 = arith.truncf %0 : vector<32x64xf32> to vector<32x64xbf16>
    %c0_1 = arith.constant 0 : index
    %c0_2 = arith.constant 0 : index
    %2 = vector.load %arg2[%c0_1, %c0_2] : memref<64x64xbf16, #tpu.memory_space<vmem>>, vector<64x64xbf16>
    %cst = arith.constant dense<0.000000e+00> : vector<32x64xf32>
    %3 = tpu.matmul %1, %2, %cst {dimension_numbers = #tpu.dot_dimension_numbers<[1], [0], [0], [1], [0, 0, 1, 1], [], []>} : vector<32x64xbf16>, vector<64x64xbf16>, vector<32x64xf32> -> vector<32x64xf32>
    %c0_3 = arith.constant 0 : index
    %c0_4 = arith.constant 0 : index
    %4 = vector.load %arg3[%c0_3, %c0_4] : memref<1x64xf32, #tpu.memory_space<vmem>>, vector<1x64xf32>
    %5 = vector.broadcast %4 : vector<1x64xf32> to vector<32x64xf32>
    %6 = arith.addf %3, %5 : vector<32x64xf32>
    %7 = arith.truncf %6 : vector<32x64xf32> to vector<32x64xbf16>
    %c0_5 = arith.constant 0 : index
    %c0_6 = arith.constant 0 : index
    %8 = vector.load %arg4[%c0_5, %c0_6] : memref<32x64xbf16, #tpu.memory_space<vmem>>, vector<32x64xbf16>
    tpu.vector_store %arg4[%c0_5, %c0_6], %7 {strides = array<i32>} : memref<32x64xbf16, #tpu.memory_space<vmem>>, vector<32x64xbf16>,
    return
  }
  func.func @transform_0(%arg0: i32) -> (i32, i32) {
    %c0_i32 = arith.constant 0 : i32
    %c0_i32_0 = arith.constant 0 : i32
    return %arg0, %c0_i32 : i32, i32
  }
  func.func @transform_1(%arg0: i32) -> (i32, i32) {
    %c0_i32 = arith.constant 0 : i32
    %c0_i32_0 = arith.constant 0 : i32
    %c0_i32_1 = arith.constant 0 : i32
    return %c0_i32, %c0_i32_0 : i32, i32
  }
  func.func @transform_2(%arg0: i32) -> (i32, i32) {
    %c0_i32 = arith.constant 0 : i32
    %c0_i32_0 = arith.constant 0 : i32
    %c0_i32_1 = arith.constant 0 : i32
    return %c0_i32, %c0_i32_0 : i32, i32
  }
  func.func @transform_3(%arg0: i32) -> (i32, i32) {
    %c0_i32 = arith.constant 0 : i32
    %c0_i32_0 = arith.constant 0 : i32
    return %arg0, %c0_i32 : i32, i32
  }
}

</mosaic_0001>

<bundles_post_ra>
// kernel: tpu_custom_call.1
= control target key start
LH: loop header
LB: loop body
LE: loop exit
PB: predicated region body
PF: predicated region fallthrough
CT: control target
= control target key end

     0   :  { %8 = vsyncpa [#allocation3], 0  ;;  %s343_s0 = inlined_call_operand.hbm [shape: f32[32,64], index: 0, kind: input, shape index: {}]   ;;  %s344_s1 = inlined_call_operand.hbm [shape: bf16[64,64], index: 1, kind: input, shape index: {}]   ;;  %s345_s2 = inlined_call_operand.vmem [shape: f32[1,64], index: 2, kind: input, shape index: {}]   ;;  %s346_s3 = inlined_call_operand.hbm [shape: bf16[32,64], index: 3, kind: output, shape index: {}]  }
   0x1   :  { %9 = vsyncpa [#allocation6], 0 }
   0x2   :  { %10 = vsyncpa [#allocation4], 0  ;;  %s294_s12 = smov [#allocation2]  }
   0x3   :  { %s16_s13 = sshll.u32 %s294_s12, 4  ;;  %s17_s13 = int_to_ptr.vmem [resolvable:$true] %s16_s13 }
   0x4   :  { %s236_s14 = scalar_lea.vmem %s17_s13, 512  ;;  %p241_p1 = scmp.lt.s32.totalorder %s17_s13, %s17_s13 }
   0x5   :  { %p237_p0 = scmp.ne.s32.totalorder %s17_s13, %s236_s14  ;;  %p242_p2 = scmp.lt.s32.totalorder %s236_s14, %s236_s14 }
   0x7   :  { %p243_p3 = por %p242_p2, %p241_p1 }
   0x9   :  { %p244_p4 = pnand %p243_p3, %p237_p0 }
   0xb   :  { %247 = shalt.err (!%p244_p4)
}
   0xc   :  { %s295_s15 = smov 128   ;;  %s296_s16 = smov 8  }
   0xd   :  { %22 = dma.hbm_to_vmem [thread:$0]  %s343_s0, 512, %s17_s13, [#allocation3], %s295_s15, %s295_s15, %s296_s16  }
   0xe   :  { %s297_s19 = smov [#allocation5]  }
   0xf   :  { %s28_s20 = sshll.u32 %s297_s19, 4  ;;  %s29_s20 = int_to_ptr.vmem [resolvable:$true] %s28_s20 }
  0x10   :  { %s256_s21 = scalar_lea.vmem %s29_s20, 512  ;;  %p261_p6 = scmp.lt.s32.totalorder %s29_s20, %s29_s20 }
  0x11   :  { %p257_p5 = scmp.ne.s32.totalorder %s29_s20, %s256_s21  ;;  %p262_p7 = scmp.lt.s32.totalorder %s256_s21, %s256_s21 }
  0x13   :  { %p263_p8 = por %p262_p7, %p261_p6 }
  0x15   :  { %p264_p9 = pnand %p263_p8, %p257_p5 }
  0x17   :  { %267 = shalt.err (!%p264_p9)
}
  0x18   :  { %s298_s22 = smov 64   ;;  %s299_s23 = smov 4  }
  0x19   :  { %34 = dma.hbm_to_vmem [thread:$0]  %s344_s1, 512, %s29_s20, [#allocation6], %s298_s22, %s298_s22, %s299_s23  }
  0x1a   :  { %288 = dma.done.wait [#allocation3], 512  }
  0x1b   :  { %289 = vsyncadd [#allocation3], 4294966784 }
  0x1c   :  { %290 = dma.done.wait [#allocation6], 512  }
  0x1d   :  { %291 = vsyncadd [#allocation6], 4294966784  ;;  %v224_v0 = vld [vmem:[#allocation5 + $0x18] sm:$0xff]   ;;  %v225_v1 = vld [vmem:[#allocation5 + $0x10] sm:$0xff]   ;;  %vm89_vm0 = vcmask 523264   ;;  %vm161_vm1 = vcmask 519168  }
  0x1e   :  { %205 = vmatprep.subr.bf16.mxu0 %v224_v0  ;;  %v226_v2 = vld [vmem:[#allocation5 + $0x8] sm:$0xff]   ;;  %v44_v3 = vld [vmem:[#allocation2] sm:$0xff]  ;;  %v46_v7 = vld [vmem:[#allocation2 + $0x10] sm:$0xff]  ;;  %s300_s26 = smov [#allocation7]  }
  0x1f   :  { %206 = vmatpush3.bf16.msra.mxu0 %v224_v0  ;;  %v45_v4 = vld [vmem:[#allocation2 + $0x8] sm:$0xff]  ;;  %v227_v6 = vld [vmem:[#allocation5] sm:$0xff]   ;;  %v47_v8 = vld [vmem:[#allocation2 + $0x18] sm:$0xff]  ;;  %s171_s27 = sshll.u32 %s300_s26, 4  ;;  %s172_s27 = int_to_ptr.vmem [resolvable:$true] %s171_s27 }
  0x20   :  { %207 = vmatprep.subr.bf16.mxu0 %v225_v1  ;;  %v48_v5 = vpack.c.bf16 %v45_v4, %v44_v3  ;;  %v49_v9 = vpack.c.bf16 %v47_v8, %v46_v7  ;;  %v184_v10 = vld [vmem:[%s345_s2] ss:$0 sm:$0xff]  ;;  %s268_s2 = scalar_lea.vmem %s172_s27, 256  ;;  %p273_p11 = scmp.lt.s32.totalorder %s172_s27, %s172_s27 }
  0x21   :  { %p269_p10 = scmp.ne.s32.totalorder %s172_s27, %s268_s2  ;;  %p274_p12 = scmp.lt.s32.totalorder %s268_s2, %s268_s2 }
  0x22   :  { %213 = vmatprep.mubr.msk.bf16.mxu0 %vm89_vm0, %v48_v5 }
  0x23   :  { %208 = vmatpush3.bf16.msra.mxu0 %v225_v1  ;;  %p275_p13 = por %p274_p12, %p273_p11 }
  0x24   :  { %209 = vmatprep.subr.bf16.mxu0 %v226_v2 }
  0x25   :  { %p276_p0 = pnand %p275_p13, %p269_p10 }
  0x27   :  { %210 = vmatpush3.bf16.msra.mxu0 %v226_v2 }
  0x28   :  { %211 = vmatprep.subr.bf16.mxu0 %v227_v6 }
  0x2b   :  { %212 = vmatpush3.bf16.msra.mxu0 %v227_v6 }
  0x2e   :  { %214 = vmatmul.mubr.msk.bf16.vlgmr.msra.gmra.mxu0 %vm89_vm0, %v49_v9 }
  0xee   :  { %v215_v11 = vpop.f32.mrf.mxu0 }
  0xef   :  { %v139_v12 = vadd.f32 %v215_v11, %v184_v10 }
  0xf0   :  { %v130_v13 = vpop.f32.mrf.mxu0 }
  0xf1   :  { %v197_v14 = vpack.c.bf16 %v139_v12, %v139_v12  ;;  %v131_v15 = vadd.f32 %v184_v10, %v130_v13 }
  0xf2   :  { %v216_v16 = vpop.f32.mrf.mxu0 }
  0xf3   :  { %164 = vst.msk [vmem:[#allocation7 + $0x8] sm:$0xf] %vm161_vm1, %v197_v14  ;;  %v195_v17 = vpack.c.bf16 %v131_v15, %v131_v15  ;;  %v142_v18 = vadd.f32 %v216_v16, %v184_v10 }
  0xf4   :  { %v133_v19 = vpop.f32.mrf.mxu0 }
  0xf5   :  { %162 = vst.msk [vmem:[#allocation7] sm:$0xf] %vm161_vm1, %v195_v17  ;;  %v198_v20 = vpack.c.bf16 %v142_v18, %v142_v18  ;;  %v134_v21 = vadd.f32 %v184_v10, %v133_v19 }
  0xf7   :  { %165 = vst.msk [vmem:[#allocation7 + $0xc] sm:$0xf] %vm161_vm1, %v198_v20  ;;  %v196_v22 = vpack.c.bf16 %v134_v21, %v134_v21 }
  0xf9   :  { %163 = vst.msk [vmem:[#allocation7 + $0x4] sm:$0xf] %vm161_vm1, %v196_v22 }
  0xfa   :  { %279 = shalt.err (!%p276_p0)
}
  0xfb   :  { %177 = dma.vmem_to_hbm [thread:$0]  %s172_s27, 256, %s346_s3, [#allocation4], %s298_s22, %s298_s22, %s299_s23  }
  0xfc   :  { %292 = dma.done.wait [#allocation4], 256  }
  0xfd   :  { %293 = vsyncadd [#allocation4], 4294967040 }
  0xfe   :  { %181 = vsyncpa [#allocation3], 1 }
  0xff   :  { %182 = vsyncpa [#allocation6], 1 }
 0x100   :  { %183 = vsyncpa [#allocation4], 1 }

</bundles_post_ra>
